<compile_context>
chip_gen: v6e
topology: v6e:2x2x1
jax: 0.10.0
libtpu: 0.0.40
codegen_flags: <defaults>
</compile_context>

<pallas_src>
import jax
import jax.numpy as jnp
from jax.experimental import pallas as pl
from jax.experimental.pallas import tpu as pltpu


def _bin_bounds(i, in_size, out_size):
    start = (i * in_size) // out_size
    end = -((-(i + 1) * in_size) // out_size)  # ceil((i+1)*in/out)
    return start, end


def _make_fused_spp_kernel(num_levels, H, W):
    levels = tuple(int(l) for l in num_levels)

    def kernel(x_ref, *o_refs):
        # x_ref block: (1, H, W, C_t), channels-last -> C_t on the lane axis.
        x = x_ref[0]  # (H, W, C_t) resident in VMEM, loaded once per step
        for lvl_idx, level in enumerate(levels):
            o_ref = o_refs[lvl_idx]
            for i in range(level):
                hs, he = _bin_bounds(i, H, level)
                # Hoist the H reduction: shared by every column bin of row i.
                # Reducing the leading axis is a pure per-lane VPU max chain.
                row_max = jnp.max(x[hs:he, :, :], axis=0)       # (W, C_t)
                for j in range(level):
                    ws, we = _bin_bounds(j, W, level)
                    m = jnp.max(row_max[ws:we, :], axis=0,
                                keepdims=True)                   # (1, C_t)
                    # Direct lane-dense store, no stacking / relayout.
                    o_ref[0, i, j:j + 1, :] = m

    return kernel


def spp_layer(x, num_levels, *, c_tile=None):
    """Pallas implementation of SPPLayer.forward.

    x: (B, C, H, W) float array.
    Returns (B, sum(C * l * l for l in num_levels)), matching PyTorch's
    torch.cat([AdaptiveMaxPool2d((l, l))(x).view(B, -1) for l in levels], 1).
    """
    B, C, H, W = x.shape

    # Channels-last so C maps to the 128-lane axis inside the kernel.
    x_cl = jnp.transpose(x, (0, 2, 3, 1))  # (B, H, W, C)

    # C-tile: lane-dense (128) when possible, otherwise the full (small) C.
    if c_tile is None:
        c_tile = 128 if (C % 128 == 0) else C
    assert C % c_tile == 0, (C, c_tile)
    grid = (B, C // c_tile)

    out_shapes = tuple(
        jax.ShapeDtypeStruct((B, l, l, C), x.dtype) for l in num_levels)
    out_specs = tuple(
        pl.BlockSpec((1, l, l, c_tile), lambda b, c: (b, 0, 0, c))
        for l in num_levels)
    in_specs = [pl.BlockSpec((1, H, W, c_tile), lambda b, c: (b, 0, 0, c))]

    outs = pl.pallas_call(
        _make_fused_spp_kernel(num_levels, H, W),
        out_shape=out_shapes,
        grid=grid,
        in_specs=in_specs,
        out_specs=out_specs,
        compiler_params=pltpu.CompilerParams(
            # Both grid axes are independent -> pipeline freely and shard
            # across the 2 TensorCores/chip on v7x.
            dimension_semantics=("parallel", "parallel")),
    )(x_cl)

    # Back to PyTorch ordering: (B, C, l, l).view(B, -1), then concat.
    pooled = [jnp.transpose(o, (0, 3, 1, 2)).reshape(B, -1) for o in outs]
    return jnp.concatenate(pooled, axis=1)


def _spp_reference(x, num_levels):
    """Pure-JAX reference (adaptive max pool per level, NCHW)."""
    B, C, H, W = x.shape
    outs = []
    for level in num_levels:
        level_out = jnp.zeros((B, C, level, level), x.dtype)
        for i in range(level):
            hs, he = _bin_bounds(i, H, level)
            for j in range(level):
                ws, we = _bin_bounds(j, W, level)
                level_out = level_out.at[:, :, i, j].set(
                    jnp.max(x[:, :, hs:he, ws:we], axis=(2, 3)))
        outs.append(level_out.reshape(B, -1))
    return jnp.concatenate(outs, axis=1)


if __name__ == "__main__":
    key = jax.random.PRNGKey(0)
    B, C, H, W = 2, 4, 16, 16
    num_levels = [1, 2, 4]  # SPPLayer(num_levels=[1, 2, 4])

    x = jax.random.normal(key, (B, C, H, W), dtype=jnp.float32)

    out = jax.block_until_ready(spp_layer(x, num_levels))

    ref = _spp_reference(x, num_levels)
    assert out.shape == (B, C * sum(l * l for l in num_levels)), out.shape
    assert jnp.allclose(out, ref), "mismatch vs reference"

    print("KERNEL_OK")
</pallas_src>

<mosaic_0001>
module attributes {stable_mosaic.version = 11 : i64} {
  func.func @kernel(%arg0: i32, %arg1: i32, %arg2: memref<1x16x16x4xf32, #tpu.memory_space<vmem>>, %arg3: memref<1x1x1x4xf32, #tpu.memory_space<vmem>>, %arg4: memref<1x2x2x4xf32, #tpu.memory_space<vmem>>, %arg5: memref<1x4x4x4xf32, #tpu.memory_space<vmem>>) attributes {dimension_semantics = [#tpu.dimension_semantics<parallel>, #tpu.dimension_semantics<parallel>], iteration_bounds = array<i64: 2, 1>, scalar_prefetch = 0 : i64, scratch_operands = 0 : i64, tpu.core_type = #tpu.core_type<tc>, window_params = [{transform_indices = @transform_0, window_bounds = array<i64: 1, 16, 16, 4>}, {transform_indices = @transform_1, window_bounds = array<i64: 1, 1, 1, 4>}, {transform_indices = @transform_2, window_bounds = array<i64: 1, 2, 2, 4>}, {transform_indices = @transform_3, window_bounds = array<i64: 1, 4, 4, 4>}]} {
    %c0 = arith.constant 0 : index
    %c0_0 = arith.constant 0 : index
    %c0_1 = arith.constant 0 : index
    %c0_2 = arith.constant 0 : index
    %0 = vector.load %arg2[%c0, %c0_0, %c0_1, %c0_2] : memref<1x16x16x4xf32, #tpu.memory_space<vmem>>, vector<1x16x16x4xf32>
    %1 = vector.shape_cast %0 : vector<1x16x16x4xf32> to vector<16x16x4xf32>
    %cst = arith.constant dense<0xFF800000> : vector<16x4xf32>
    %2 = vector.multi_reduction <maximumf>, %1, %cst [0] : vector<16x16x4xf32> to vector<16x4xf32>
    %cst_3 = arith.constant dense<0xFF800000> : vector<4xf32>
    %3 = vector.multi_reduction <maximumf>, %2, %cst_3 [0] : vector<16x4xf32> to vector<4xf32>
    %4 = vector.shape_cast %3 : vector<4xf32> to vector<1x4xf32>
    %c0_4 = arith.constant 0 : index
    %c0_5 = arith.constant 0 : index
    %c0_6 = arith.constant 0 : index
    %c0_7 = arith.constant 0 : index
    %5 = vector.load %arg3[%c0_4, %c0_5, %c0_6, %c0_7] : memref<1x1x1x4xf32, #tpu.memory_space<vmem>>, vector<1x1x1x4xf32>
    %6 = vector.shape_cast %5 : vector<1x1x1x4xf32> to vector<1x4xf32>
    %7 = vector.shape_cast %4 : vector<1x4xf32> to vector<1x1x1x4xf32>
    tpu.vector_store %arg3[%c0_4, %c0_5, %c0_6, %c0_7], %7 {strides = array<i32>} : memref<1x1x1x4xf32, #tpu.memory_space<vmem>>, vector<1x1x1x4xf32>,
    %8 = vector.extract_strided_slice %1 {offsets = [0, 0, 0], sizes = [8, 16, 4], strides = [1, 1, 1]} : vector<16x16x4xf32> to vector<8x16x4xf32>
    %cst_8 = arith.constant dense<0xFF800000> : vector<16x4xf32>
    %9 = vector.multi_reduction <maximumf>, %8, %cst_8 [0] : vector<8x16x4xf32> to vector<16x4xf32>
    %10 = vector.extract_strided_slice %9 {offsets = [0, 0], sizes = [8, 4], strides = [1, 1]} : vector<16x4xf32> to vector<8x4xf32>
    %cst_9 = arith.constant dense<0xFF800000> : vector<4xf32>
    %11 = vector.multi_reduction <maximumf>, %10, %cst_9 [0] : vector<8x4xf32> to vector<4xf32>
    %12 = vector.shape_cast %11 : vector<4xf32> to vector<1x4xf32>
    %c0_10 = arith.constant 0 : index
    %c0_11 = arith.constant 0 : index
    %c0_12 = arith.constant 0 : index
    %c0_13 = arith.constant 0 : index
    %13 = vector.load %arg4[%c0_10, %c0_11, %c0_12, %c0_13] : memref<1x2x2x4xf32, #tpu.memory_space<vmem>>, vector<1x1x1x4xf32>
    %14 = vector.shape_cast %13 : vector<1x1x1x4xf32> to vector<1x4xf32>
    %15 = vector.shape_cast %12 : vector<1x4xf32> to vector<1x1x1x4xf32>
    tpu.vector_store %arg4[%c0_10, %c0_11, %c0_12, %c0_13], %15 {strides = array<i32>} : memref<1x2x2x4xf32, #tpu.memory_space<vmem>>, vector<1x1x1x4xf32>,
    %16 = vector.extract_strided_slice %9 {offsets = [8, 0], sizes = [8, 4], strides = [1, 1]} : vector<16x4xf32> to vector<8x4xf32>
    %cst_14 = arith.constant dense<0xFF800000> : vector<4xf32>
    %17 = vector.multi_reduction <maximumf>, %16, %cst_14 [0] : vector<8x4xf32> to vector<4xf32>
    %18 = vector.shape_cast %17 : vector<4xf32> to vector<1x4xf32>
    %c0_15 = arith.constant 0 : index
    %c0_16 = arith.constant 0 : index
    %c1 = arith.constant 1 : index
    %c0_17 = arith.constant 0 : index
    %19 = vector.load %arg4[%c0_15, %c0_16, %c1, %c0_17] : memref<1x2x2x4xf32, #tpu.memory_space<vmem>>, vector<1x1x1x4xf32>
    %20 = vector.shape_cast %19 : vector<1x1x1x4xf32> to vector<1x4xf32>
    %21 = vector.shape_cast %18 : vector<1x4xf32> to vector<1x1x1x4xf32>
    tpu.vector_store %arg4[%c0_15, %c0_16, %c1, %c0_17], %21 {strides = array<i32>} : memref<1x2x2x4xf32, #tpu.memory_space<vmem>>, vector<1x1x1x4xf32>,
    %22 = vector.extract_strided_slice %1 {offsets = [8, 0, 0], sizes = [8, 16, 4], strides = [1, 1, 1]} : vector<16x16x4xf32> to vector<8x16x4xf32>
    %cst_18 = arith.constant dense<0xFF800000> : vector<16x4xf32>
    %23 = vector.multi_reduction <maximumf>, %22, %cst_18 [0] : vector<8x16x4xf32> to vector<16x4xf32>
    %24 = vector.extract_strided_slice %23 {offsets = [0, 0], sizes = [8, 4], strides = [1, 1]} : vector<16x4xf32> to vector<8x4xf32>
    %cst_19 = arith.constant dense<0xFF800000> : vector<4xf32>
    %25 = vector.multi_reduction <maximumf>, %24, %cst_19 [0] : vector<8x4xf32> to vector<4xf32>
    %26 = vector.shape_cast %25 : vector<4xf32> to vector<1x4xf32>
    %c0_20 = arith.constant 0 : index
    %c1_21 = arith.constant 1 : index
    %c0_22 = arith.constant 0 : index
    %c0_23 = arith.constant 0 : index
    %27 = vector.load %arg4[%c0_20, %c1_21, %c0_22, %c0_23] : memref<1x2x2x4xf32, #tpu.memory_space<vmem>>, vector<1x1x1x4xf32>
    %28 = vector.shape_cast %27 : vector<1x1x1x4xf32> to vector<1x4xf32>
    %29 = vector.shape_cast %26 : vector<1x4xf32> to vector<1x1x1x4xf32>
    tpu.vector_store %arg4[%c0_20, %c1_21, %c0_22, %c0_23], %29 {strides = array<i32>} : memref<1x2x2x4xf32, #tpu.memory_space<vmem>>, vector<1x1x1x4xf32>,
    %30 = vector.extract_strided_slice %23 {offsets = [8, 0], sizes = [8, 4], strides = [1, 1]} : vector<16x4xf32> to vector<8x4xf32>
    %cst_24 = arith.constant dense<0xFF800000> : vector<4xf32>
    %31 = vector.multi_reduction <maximumf>, %30, %cst_24 [0] : vector<8x4xf32> to vector<4xf32>
    %32 = vector.shape_cast %31 : vector<4xf32> to vector<1x4xf32>
    %c0_25 = arith.constant 0 : index
    %c1_26 = arith.constant 1 : index
    %c1_27 = arith.constant 1 : index
    %c0_28 = arith.constant 0 : index
    %33 = vector.load %arg4[%c0_25, %c1_26, %c1_27, %c0_28] : memref<1x2x2x4xf32, #tpu.memory_space<vmem>>, vector<1x1x1x4xf32>
    %34 = vector.shape_cast %33 : vector<1x1x1x4xf32> to vector<1x4xf32>
    %35 = vector.shape_cast %32 : vector<1x4xf32> to vector<1x1x1x4xf32>
    tpu.vector_store %arg4[%c0_25, %c1_26, %c1_27, %c0_28], %35 {strides = array<i32>} : memref<1x2x2x4xf32, #tpu.memory_space<vmem>>, vector<1x1x1x4xf32>,
    %36 = vector.extract_strided_slice %1 {offsets = [0, 0, 0], sizes = [4, 16, 4], strides = [1, 1, 1]} : vector<16x16x4xf32> to vector<4x16x4xf32>
    %cst_29 = arith.constant dense<0xFF800000> : vector<16x4xf32>
    %37 = vector.multi_reduction <maximumf>, %36, %cst_29 [0] : vector<4x16x4xf32> to vector<16x4xf32>
    %38 = vector.extract_strided_slice %37 {offsets = [0, 0], sizes = [4, 4], strides = [1, 1]} : vector<16x4xf32> to vector<4x4xf32>
    %cst_30 = arith.constant dense<0xFF800000> : vector<4xf32>
    %39 = vector.multi_reduction <maximumf>, %38, %cst_30 [0] : vector<4x4xf32> to vector<4xf32>
    %40 = vector.shape_cast %39 : vector<4xf32> to vector<1x4xf32>
    %c0_31 = arith.constant 0 : index
    %c0_32 = arith.constant 0 : index
    %c0_33 = arith.constant 0 : index
    %c0_34 = arith.constant 0 : index
    %41 = vector.load %arg5[%c0_31, %c0_32, %c0_33, %c0_34] : memref<1x4x4x4xf32, #tpu.memory_space<vmem>>, vector<1x1x1x4xf32>
    %42 = vector.shape_cast %41 : vector<1x1x1x4xf32> to vector<1x4xf32>
    %43 = vector.shape_cast %40 : vector<1x4xf32> to vector<1x1x1x4xf32>
    tpu.vector_store %arg5[%c0_31, %c0_32, %c0_33, %c0_34], %43 {strides = array<i32>} : memref<1x4x4x4xf32, #tpu.memory_space<vmem>>, vector<1x1x1x4xf32>,
    %44 = vector.extract_strided_slice %37 {offsets = [4, 0], sizes = [4, 4], strides = [1, 1]} : vector<16x4xf32> to vector<4x4xf32>
    %cst_35 = arith.constant dense<0xFF800000> : vector<4xf32>
    %45 = vector.multi_reduction <maximumf>, %44, %cst_35 [0] : vector<4x4xf32> to vector<4xf32>
    %46 = vector.shape_cast %45 : vector<4xf32> to vector<1x4xf32>
    %c0_36 = arith.constant 0 : index
    %c0_37 = arith.constant 0 : index
    %c1_38 = arith.constant 1 : index
    %c0_39 = arith.constant 0 : index
    %47 = vector.load %arg5[%c0_36, %c0_37, %c1_38, %c0_39] : memref<1x4x4x4xf32, #tpu.memory_space<vmem>>, vector<1x1x1x4xf32>
    %48 = vector.shape_cast %47 : vector<1x1x1x4xf32> to vector<1x4xf32>
    %49 = vector.shape_cast %46 : vector<1x4xf32> to vector<1x1x1x4xf32>
    tpu.vector_store %arg5[%c0_36, %c0_37, %c1_38, %c0_39], %49 {strides = array<i32>} : memref<1x4x4x4xf32, #tpu.memory_space<vmem>>, vector<1x1x1x4xf32>,
    %50 = vector.extract_strided_slice %37 {offsets = [8, 0], sizes = [4, 4], strides = [1, 1]} : vector<16x4xf32> to vector<4x4xf32>
    %cst_40 = arith.constant dense<0xFF800000> : vector<4xf32>
    %51 = vector.multi_reduction <maximumf>, %50, %cst_40 [0] : vector<4x4xf32> to vector<4xf32>
    %52 = vector.shape_cast %51 : vector<4xf32> to vector<1x4xf32>
    %c0_41 = arith.constant 0 : index
    %c0_42 = arith.constant 0 : index
    %c2 = arith.constant 2 : index
    %c0_43 = arith.constant 0 : index
    %53 = vector.load %arg5[%c0_41, %c0_42, %c2, %c0_43] : memref<1x4x4x4xf32, #tpu.memory_space<vmem>>, vector<1x1x1x4xf32>
    %54 = vector.shape_cast %53 : vector<1x1x1x4xf32> to vector<1x4xf32>
    %55 = vector.shape_cast %52 : vector<1x4xf32> to vector<1x1x1x4xf32>
    tpu.vector_store %arg5[%c0_41, %c0_42, %c2, %c0_43], %55 {strides = array<i32>} : memref<1x4x4x4xf32, #tpu.memory_space<vmem>>, vector<1x1x1x4xf32>,
    %56 = vector.extract_strided_slice %37 {offsets = [12, 0], sizes = [4, 4], strides = [1, 1]} : vector<16x4xf32> to vector<4x4xf32>
    %cst_44 = arith.constant dense<0xFF800000> : vector<4xf32>
    %57 = vector.multi_reduction <maximumf>, %56, %cst_44 [0] : vector<4x4xf32> to vector<4xf32>
    %58 = vector.shape_cast %57 : vector<4xf32> to vector<1x4xf32>
    %c0_45 = arith.constant 0 : index
    %c0_46 = arith.constant 0 : index
    %c3 = arith.constant 3 : index
    %c0_47 = arith.constant 0 : index
    %59 = vector.load %arg5[%c0_45, %c0_46, %c3, %c0_47] : memref<1x4x4x4xf32, #tpu.memory_space<vmem>>, vector<1x1x1x4xf32>
    %60 = vector.shape_cast %59 : vector<1x1x1x4xf32> to vector<1x4xf32>
    %61 = vector.shape_cast %58 : vector<1x4xf32> to vector<1x1x1x4xf32>
    tpu.vector_store %arg5[%c0_45, %c0_46, %c3, %c0_47], %61 {strides = array<i32>} : memref<1x4x4x4xf32, #tpu.memory_space<vmem>>, vector<1x1x1x4xf32>,
    %62 = vector.extract_strided_slice %1 {offsets = [4, 0, 0], sizes = [4, 16, 4], strides = [1, 1, 1]} : vector<16x16x4xf32> to vector<4x16x4xf32>
    %cst_48 = arith.constant dense<0xFF800000> : vector<16x4xf32>
    %63 = vector.multi_reduction <maximumf>, %62, %cst_48 [0] : vector<4x16x4xf32> to vector<16x4xf32>
    %64 = vector.extract_strided_slice %63 {offsets = [0, 0], sizes = [4, 4], strides = [1, 1]} : vector<16x4xf32> to vector<4x4xf32>
    %cst_49 = arith.constant dense<0xFF800000> : vector<4xf32>
    %65 = vector.multi_reduction <maximumf>, %64, %cst_49 [0] : vector<4x4xf32> to vector<4xf32>
    %66 = vector.shape_cast %65 : vector<4xf32> to vector<1x4xf32>
    %c0_50 = arith.constant 0 : index
    %c1_51 = arith.constant 1 : index
    %c0_52 = arith.constant 0 : index
    %c0_53 = arith.constant 0 : index
    %67 = vector.load %arg5[%c0_50, %c1_51, %c0_52, %c0_53] : memref<1x4x4x4xf32, #tpu.memory_space<vmem>>, vector<1x1x1x4xf32>
    %68 = vector.shape_cast %67 : vector<1x1x1x4xf32> to vector<1x4xf32>
    %69 = vector.shape_cast %66 : vector<1x4xf32> to vector<1x1x1x4xf32>
    tpu.vector_store %arg5[%c0_50, %c1_51, %c0_52, %c0_53], %69 {strides = array<i32>} : memref<1x4x4x4xf32, #tpu.memory_space<vmem>>, vector<1x1x1x4xf32>,
    %70 = vector.extract_strided_slice %63 {offsets = [4, 0], sizes = [4, 4], strides = [1, 1]} : vector<16x4xf32> to vector<4x4xf32>
    %cst_54 = arith.constant dense<0xFF800000> : vector<4xf32>
    %71 = vector.multi_reduction <maximumf>, %70, %cst_54 [0] : vector<4x4xf32> to vector<4xf32>
    %72 = vector.shape_cast %71 : vector<4xf32> to vector<1x4xf32>
    %c0_55 = arith.constant 0 : index
    %c1_56 = arith.constant 1 : index
    %c1_57 = arith.constant 1 : index
    %c0_58 = arith.constant 0 : index
    %73 = vector.load %arg5[%c0_55, %c1_56, %c1_57, %c0_58] : memref<1x4x4x4xf32, #tpu.memory_space<vmem>>, vector<1x1x1x4xf32>
    %74 = vector.shape_cast %73 : vector<1x1x1x4xf32> to vector<1x4xf32>
    %75 = vector.shape_cast %72 : vector<1x4xf32> to vector<1x1x1x4xf32>
    tpu.vector_store %arg5[%c0_55, %c1_56, %c1_57, %c0_58], %75 {strides = array<i32>} : memref<1x4x4x4xf32, #tpu.memory_space<vmem>>, vector<1x1x1x4xf32>,
    %76 = vector.extract_strided_slice %63 {offsets = [8, 0], sizes = [4, 4], strides = [1, 1]} : vector<16x4xf32> to vector<4x4xf32>
    %cst_59 = arith.constant dense<0xFF800000> : vector<4xf32>
    %77 = vector.multi_reduction <maximumf>, %76, %cst_59 [0] : vector<4x4xf32> to vector<4xf32>
    %78 = vector.shape_cast %77 : vector<4xf32> to vector<1x4xf32>
    %c0_60 = arith.constant 0 : index
    %c1_61 = arith.constant 1 : index
    %c2_62 = arith.constant 2 : index
    %c0_63 = arith.constant 0 : index
    %79 = vector.load %arg5[%c0_60, %c1_61, %c2_62, %c0_63] : memref<1x4x4x4xf32, #tpu.memory_space<vmem>>, vector<1x1x1x4xf32>
    %80 = vector.shape_cast %79 : vector<1x1x1x4xf32> to vector<1x4xf32>
    %81 = vector.shape_cast %78 : vector<1x4xf32> to vector<1x1x1x4xf32>
    tpu.vector_store %arg5[%c0_60, %c1_61, %c2_62, %c0_63], %81 {strides = array<i32>} : memref<1x4x4x4xf32, #tpu.memory_space<vmem>>, vector<1x1x1x4xf32>,
    %82 = vector.extract_strided_slice %63 {offsets = [12, 0], sizes = [4, 4], strides = [1, 1]} : vector<16x4xf32> to vector<4x4xf32>
    %cst_64 = arith.constant dense<0xFF800000> : vector<4xf32>
    %83 = vector.multi_reduction <maximumf>, %82, %cst_64 [0] : vector<4x4xf32> to vector<4xf32>
    %84 = vector.shape_cast %83 : vector<4xf32> to vector<1x4xf32>
    %c0_65 = arith.constant 0 : index
    %c1_66 = arith.constant 1 : index
    %c3_67 = arith.constant 3 : index
    %c0_68 = arith.constant 0 : index
    %85 = vector.load %arg5[%c0_65, %c1_66, %c3_67, %c0_68] : memref<1x4x4x4xf32, #tpu.memory_space<vmem>>, vector<1x1x1x4xf32>
    %86 = vector.shape_cast %85 : vector<1x1x1x4xf32> to vector<1x4xf32>
    %87 = vector.shape_cast %84 : vector<1x4xf32> to vector<1x1x1x4xf32>
    tpu.vector_store %arg5[%c0_65, %c1_66, %c3_67, %c0_68], %87 {strides = array<i32>} : memref<1x4x4x4xf32, #tpu.memory_space<vmem>>, vector<1x1x1x4xf32>,
    %88 = vector.extract_strided_slice %1 {offsets = [8, 0, 0], sizes = [4, 16, 4], strides = [1, 1, 1]} : vector<16x16x4xf32> to vector<4x16x4xf32>
    %cst_69 = arith.constant dense<0xFF800000> : vector<16x4xf32>
    %89 = vector.multi_reduction <maximumf>, %88, %cst_69 [0] : vector<4x16x4xf32> to vector<16x4xf32>
    %90 = vector.extract_strided_slice %89 {offsets = [0, 0], sizes = [4, 4], strides = [1, 1]} : vector<16x4xf32> to vector<4x4xf32>
    %cst_70 = arith.constant dense<0xFF800000> : vector<4xf32>
    %91 = vector.multi_reduction <maximumf>, %90, %cst_70 [0] : vector<4x4xf32> to vector<4xf32>
    %92 = vector.shape_cast %91 : vector<4xf32> to vector<1x4xf32>
    %c0_71 = arith.constant 0 : index
    %c2_72 = arith.constant 2 : index
    %c0_73 = arith.constant 0 : index
    %c0_74 = arith.constant 0 : index
    %93 = vector.load %arg5[%c0_71, %c2_72, %c0_73, %c0_74] : memref<1x4x4x4xf32, #tpu.memory_space<vmem>>, vector<1x1x1x4xf32>
    %94 = vector.shape_cast %93 : vector<1x1x1x4xf32> to vector<1x4xf32>
    %95 = vector.shape_cast %92 : vector<1x4xf32> to vector<1x1x1x4xf32>
    tpu.vector_store %arg5[%c0_71, %c2_72, %c0_73, %c0_74], %95 {strides = array<i32>} : memref<1x4x4x4xf32, #tpu.memory_space<vmem>>, vector<1x1x1x4xf32>,
    %96 = vector.extract_strided_slice %89 {offsets = [4, 0], sizes = [4, 4], strides = [1, 1]} : vector<16x4xf32> to vector<4x4xf32>
    %cst_75 = arith.constant dense<0xFF800000> : vector<4xf32>
    %97 = vector.multi_reduction <maximumf>, %96, %cst_75 [0] : vector<4x4xf32> to vector<4xf32>
    %98 = vector.shape_cast %97 : vector<4xf32> to vector<1x4xf32>
    %c0_76 = arith.constant 0 : index
    %c2_77 = arith.constant 2 : index
    %c1_78 = arith.constant 1 : index
    %c0_79 = arith.constant 0 : index
    %99 = vector.load %arg5[%c0_76, %c2_77, %c1_78, %c0_79] : memref<1x4x4x4xf32, #tpu.memory_space<vmem>>, vector<1x1x1x4xf32>
    %100 = vector.shape_cast %99 : vector<1x1x1x4xf32> to vector<1x4xf32>
    %101 = vector.shape_cast %98 : vector<1x4xf32> to vector<1x1x1x4xf32>
    tpu.vector_store %arg5[%c0_76, %c2_77, %c1_78, %c0_79], %101 {strides = array<i32>} : memref<1x4x4x4xf32, #tpu.memory_space<vmem>>, vector<1x1x1x4xf32>,
    %102 = vector.extract_strided_slice %89 {offsets = [8, 0], sizes = [4, 4], strides = [1, 1]} : vector<16x4xf32> to vector<4x4xf32>
    %cst_80 = arith.constant dense<0xFF800000> : vector<4xf32>
    %103 = vector.multi_reduction <maximumf>, %102, %cst_80 [0] : vector<4x4xf32> to vector<4xf32>
    %104 = vector.shape_cast %103 : vector<4xf32> to vector<1x4xf32>
    %c0_81 = arith.constant 0 : index
    %c2_82 = arith.constant 2 : index
    %c2_83 = arith.constant 2 : index
    %c0_84 = arith.constant 0 : index
    %105 = vector.load %arg5[%c0_81, %c2_82, %c2_83, %c0_84] : memref<1x4x4x4xf32, #tpu.memory_space<vmem>>, vector<1x1x1x4xf32>
    %106 = vector.shape_cast %105 : vector<1x1x1x4xf32> to vector<1x4xf32>
    %107 = vector.shape_cast %104 : vector<1x4xf32> to vector<1x1x1x4xf32>
    tpu.vector_store %arg5[%c0_81, %c2_82, %c2_83, %c0_84], %107 {strides = array<i32>} : memref<1x4x4x4xf32, #tpu.memory_space<vmem>>, vector<1x1x1x4xf32>,
    %108 = vector.extract_strided_slice %89 {offsets = [12, 0], sizes = [4, 4], strides = [1, 1]} : vector<16x4xf32> to vector<4x4xf32>
    %cst_85 = arith.constant dense<0xFF800000> : vector<4xf32>
    %109 = vector.multi_reduction <maximumf>, %108, %cst_85 [0] : vector<4x4xf32> to vector<4xf32>
    %110 = vector.shape_cast %109 : vector<4xf32> to vector<1x4xf32>
    %c0_86 = arith.constant 0 : index
    %c2_87 = arith.constant 2 : index
    %c3_88 = arith.constant 3 : index
    %c0_89 = arith.constant 0 : index
    %111 = vector.load %arg5[%c0_86, %c2_87, %c3_88, %c0_89] : memref<1x4x4x4xf32, #tpu.memory_space<vmem>>, vector<1x1x1x4xf32>
    %112 = vector.shape_cast %111 : vector<1x1x1x4xf32> to vector<1x4xf32>
    %113 = vector.shape_cast %110 : vector<1x4xf32> to vector<1x1x1x4xf32>
    tpu.vector_store %arg5[%c0_86, %c2_87, %c3_88, %c0_89], %113 {strides = array<i32>} : memref<1x4x4x4xf32, #tpu.memory_space<vmem>>, vector<1x1x1x4xf32>,
    %114 = vector.extract_strided_slice %1 {offsets = [12, 0, 0], sizes = [4, 16, 4], strides = [1, 1, 1]} : vector<16x16x4xf32> to vector<4x16x4xf32>
    %cst_90 = arith.constant dense<0xFF800000> : vector<16x4xf32>
    %115 = vector.multi_reduction <maximumf>, %114, %cst_90 [0] : vector<4x16x4xf32> to vector<16x4xf32>
    %116 = vector.extract_strided_slice %115 {offsets = [0, 0], sizes = [4, 4], strides = [1, 1]} : vector<16x4xf32> to vector<4x4xf32>
    %cst_91 = arith.constant dense<0xFF800000> : vector<4xf32>
    %117 = vector.multi_reduction <maximumf>, %116, %cst_91 [0] : vector<4x4xf32> to vector<4xf32>
    %118 = vector.shape_cast %117 : vector<4xf32> to vector<1x4xf32>
    %c0_92 = arith.constant 0 : index
    %c3_93 = arith.constant 3 : index
    %c0_94 = arith.constant 0 : index
    %c0_95 = arith.constant 0 : index
    %119 = vector.load %arg5[%c0_92, %c3_93, %c0_94, %c0_95] : memref<1x4x4x4xf32, #tpu.memory_space<vmem>>, vector<1x1x1x4xf32>
    %120 = vector.shape_cast %119 : vector<1x1x1x4xf32> to vector<1x4xf32>
    %121 = vector.shape_cast %118 : vector<1x4xf32> to vector<1x1x1x4xf32>
    tpu.vector_store %arg5[%c0_92, %c3_93, %c0_94, %c0_95], %121 {strides = array<i32>} : memref<1x4x4x4xf32, #tpu.memory_space<vmem>>, vector<1x1x1x4xf32>,
    %122 = vector.extract_strided_slice %115 {offsets = [4, 0], sizes = [4, 4], strides = [1, 1]} : vector<16x4xf32> to vector<4x4xf32>
    %cst_96 = arith.constant dense<0xFF800000> : vector<4xf32>
    %123 = vector.multi_reduction <maximumf>, %122, %cst_96 [0] : vector<4x4xf32> to vector<4xf32>
    %124 = vector.shape_cast %123 : vector<4xf32> to vector<1x4xf32>
    %c0_97 = arith.constant 0 : index
    %c3_98 = arith.constant 3 : index
    %c1_99 = arith.constant 1 : index
    %c0_100 = arith.constant 0 : index
    %125 = vector.load %arg5[%c0_97, %c3_98, %c1_99, %c0_100] : memref<1x4x4x4xf32, #tpu.memory_space<vmem>>, vector<1x1x1x4xf32>
    %126 = vector.shape_cast %125 : vector<1x1x1x4xf32> to vector<1x4xf32>
    %127 = vector.shape_cast %124 : vector<1x4xf32> to vector<1x1x1x4xf32>
    tpu.vector_store %arg5[%c0_97, %c3_98, %c1_99, %c0_100], %127 {strides = array<i32>} : memref<1x4x4x4xf32, #tpu.memory_space<vmem>>, vector<1x1x1x4xf32>,
    %128 = vector.extract_strided_slice %115 {offsets = [8, 0], sizes = [4, 4], strides = [1, 1]} : vector<16x4xf32> to vector<4x4xf32>
    %cst_101 = arith.constant dense<0xFF800000> : vector<4xf32>
    %129 = vector.multi_reduction <maximumf>, %128, %cst_101 [0] : vector<4x4xf32> to vector<4xf32>
    %130 = vector.shape_cast %129 : vector<4xf32> to vector<1x4xf32>
    %c0_102 = arith.constant 0 : index
    %c3_103 = arith.constant 3 : index
    %c2_104 = arith.constant 2 : index
    %c0_105 = arith.constant 0 : index
    %131 = vector.load %arg5[%c0_102, %c3_103, %c2_104, %c0_105] : memref<1x4x4x4xf32, #tpu.memory_space<vmem>>, vector<1x1x1x4xf32>
    %132 = vector.shape_cast %131 : vector<1x1x1x4xf32> to vector<1x4xf32>
    %133 = vector.shape_cast %130 : vector<1x4xf32> to vector<1x1x1x4xf32>
    tpu.vector_store %arg5[%c0_102, %c3_103, %c2_104, %c0_105], %133 {strides = array<i32>} : memref<1x4x4x4xf32, #tpu.memory_space<vmem>>, vector<1x1x1x4xf32>,
    %134 = vector.extract_strided_slice %115 {offsets = [12, 0], sizes = [4, 4], strides = [1, 1]} : vector<16x4xf32> to vector<4x4xf32>
    %cst_106 = arith.constant dense<0xFF800000> : vector<4xf32>
    %135 = vector.multi_reduction <maximumf>, %134, %cst_106 [0] : vector<4x4xf32> to vector<4xf32>
    %136 = vector.shape_cast %135 : vector<4xf32> to vector<1x4xf32>
    %c0_107 = arith.constant 0 : index
    %c3_108 = arith.constant 3 : index
    %c3_109 = arith.constant 3 : index
    %c0_110 = arith.constant 0 : index
    %137 = vector.load %arg5[%c0_107, %c3_108, %c3_109, %c0_110] : memref<1x4x4x4xf32, #tpu.memory_space<vmem>>, vector<1x1x1x4xf32>
    %138 = vector.shape_cast %137 : vector<1x1x1x4xf32> to vector<1x4xf32>
    %139 = vector.shape_cast %136 : vector<1x4xf32> to vector<1x1x1x4xf32>
    tpu.vector_store %arg5[%c0_107, %c3_108, %c3_109, %c0_110], %139 {strides = array<i32>} : memref<1x4x4x4xf32, #tpu.memory_space<vmem>>, vector<1x1x1x4xf32>,
    return
  }
  func.func @transform_0(%arg0: i32, %arg1: i32) -> (i32, i32, i32, i32) {
    %c0_i32 = arith.constant 0 : i32
    %c0_i32_0 = arith.constant 0 : i32
    %c0_i32_1 = arith.constant 0 : i32
    return %arg0, %c0_i32, %c0_i32_0, %arg1 : i32, i32, i32, i32
  }
  func.func @transform_1(%arg0: i32, %arg1: i32) -> (i32, i32, i32, i32) {
    %c0_i32 = arith.constant 0 : i32
    %c0_i32_0 = arith.constant 0 : i32
    %c0_i32_1 = arith.constant 0 : i32
    return %arg0, %c0_i32, %c0_i32_0, %arg1 : i32, i32, i32, i32
  }
  func.func @transform_2(%arg0: i32, %arg1: i32) -> (i32, i32, i32, i32) {
    %c0_i32 = arith.constant 0 : i32
    %c0_i32_0 = arith.constant 0 : i32
    %c0_i32_1 = arith.constant 0 : i32
    return %arg0, %c0_i32, %c0_i32_0, %arg1 : i32, i32, i32, i32
  }
  func.func @transform_3(%arg0: i32, %arg1: i32) -> (i32, i32, i32, i32) {
    %c0_i32 = arith.constant 0 : i32
    %c0_i32_0 = arith.constant 0 : i32
    %c0_i32_1 = arith.constant 0 : i32
    return %arg0, %c0_i32, %c0_i32_0, %arg1 : i32, i32, i32, i32
  }
}

</mosaic_0001>

<bundles_post_ra>
// kernel: tpu_custom_call.1
= control target key start
LH: loop header
LB: loop body
LE: loop exit
PB: predicated region body
PF: predicated region fallthrough
CT: control target
= control target key end

     0   :  { %9 = vsyncpa [#allocation3], 0  ;;  %s1412_s0 = inlined_call_operand.vmem [shape: f32[2,16,16,4], index: 0, kind: input, shape index: {}]   ;;  %s1413_s1 = inlined_call_operand.hbm [shape: f32[2,1,1,4], index: 1, kind: output, shape index: {0}]   ;;  %s1414_s2 = inlined_call_operand.hbm [shape: f32[2,2,2,4], index: 2, kind: output, shape index: {1}]   ;;  %s1415_s3 = inlined_call_operand.hbm [shape: f32[2,4,4,4], index: 3, kind: output, shape index: {2}]  }
   0x1   :  { %11 = vsyncpa [#allocation3 + $0x1], 0 }
   0x2   :  { %12 = vsyncpa [#allocation5], 0 }
   0x3   :  { %14 = vsyncpa [#allocation5 + $0x1], 0  ;;  %s977_s12 = smov 0   ;;  %s979_s13 = smov 0  }
   0x4   :  { %s981_s14 = smov 0   ;;  %s983_s15 = smov 0  }
   0x5   :  { %s985_s16 = smov 0   ;;  %s987_s17 = smov 0  }
   0x6 LB: > { %s712_s18 = sadd.s32 4294967295, %s948_s17   ;;  %s1416_s19 = sadd.s32 4294967294, %s948_s17   ;;  %s948_s17 = sphi %s987_s17, %s20_s17   ;;  %s944_s16 = sphi %s985_s16, %s1426_s16   ;;  %s940_s15 = sphi %s983_s15, %s1425_s15   ;;  %s936_s14 = sphi %s981_s14, %s1424_s14   ;;  %s932_s13 = sphi %s979_s13, %s1423_s13   ;;  %s928_s12 = sphi %s977_s12, %s1422_s12  }
   0x7   : > { %s32_s20 = sadd.s32 1, %s944_s16  ;;  %s69_s21 = sadd.s32 1, %s936_s14 }
   0x8   : > { %p34_p0 = scmp.ge.s32.totalorder %s32_s20, 2  ;;  %p79_p1 = scmp.ne.s32.totalorder %s936_s14, %s932_s13 }
   0x9   : > { %p80_p2 = scmp.eq.s32.totalorder %s712_s18, 1  ;;  %p85_p3 = scmp.ne.s32.totalorder %s932_s13, %s928_s12 }
   0xa   : > { %s1428_s20 = smov (%p34_p0, %s32_s20), 0  ;;  %p86_p5 = scmp.eq.s32.totalorder %s1416_s19, 1 }
   0xb   : > { %p1019_p4 = por %p80_p2, %p79_p1  ;;  %s64_s23 = ssub.s32 %s944_s16, %s1428_s20 }
   0xc   : > { %p716_p6 = scmp.ge.s32.totalorder %s948_s17, 1  ;;  %p67_p7 = scmp.eq.s32.totalorder %s64_s23, 0 }
   0xd   : > { %p1028_p8 = por %p86_p5, %p85_p3  ;;  %p171_p9 = scmp.lt.s32.totalorder %s948_s17, 3 }
   0xe   : > { %s1034_s25 = scalar_select %p67_p7, %s936_s14, %s69_s21  }
   0xf   : > { %p172_p10 = pnand %p716_p6, %p171_p9 }
  0x10   : > { %p207_p11 = scmp.lt.s32.totalorder (!%p172_p10), %s940_s15, 1  ;;  %s1156_s4 = sand.u32 (!%p172_p10), 1, %s932_s13  }
  0x11   : > { %175 = sbr.rel (%p172_p10) target bundleno = 149 (0x95), region = 24  ;;  %s717_s5 = sshll.u32 (!%p172_p10), %s1156_s4, 2 }
  0x12   : > { %s1194_s6 = scalar_lea.vmem (!%p172_p10), [#allocation4], %s717_s5  ;;  %s718_s7 = sshll.u32 (!%p172_p10), %s1156_s4, 4 }
  0x13   : > { %s557_s8 = sshll.u32 (!%p172_p10), %s1194_s6, 4  ;;  %s1219_s9 = sand.u32 (!%p172_p10), 1, %s712_s18   ;;  %s1222_s8 = int_to_ptr.vmem [resolvable:$true] %s557_s8 }
  0x14   : > { %s745_s10 = sshll.u32 (!%p172_p10), %s940_s15, 6  ;;  %s1417_s11 = scalar_lea.vmem (!%p172_p10), [#allocation2], %s1156_s4 }
  0x15   : > { %s543_s21 = sshll.u32 (!%p172_p10), %s1417_s11, 4  ;;  %s1245_s28 = scalar_lea.vmem (!%p172_p10), [#allocation6], %s718_s7  ;;  %s1239_s21 = int_to_ptr.vmem [resolvable:$true] %s543_s21 }
  0x16   : > { %s208_s26 = scalar_select %p207_p11, %s940_s15, 1  ;;  %vm247_vm0 = vcmask 31744   ;;  %vm319_vm1 = vcmask 24576   ;;  %vm372_vm2 = vcmask 27648   ;;  %vm381_vm3 = vcmask 31748  }
  0x17   : > { %s524_s29 = scalar_lea.sflag [#allocation5], %s1219_s9  ;;  %s950_s5 = smov [#allocation4]  }
  0x18   : > { %s744_s27 = sshll.u32 %s208_s26, 8  ;;  %s1233_s26 = scalar_lea.hbm %s1414_s2, %s745_s10 }
  0x19   : > { %s1041_s30 = scalar_lea.vmem %s1412_s0, %s744_s27  ;;  %s737_s27 = sshll.u32 %s940_s15, 4 }
  0x1a   : > { %v215_v0 = vld [vmem:[%s1041_s30] sm:$0xff]  ;;  %v217_v1 = vld [vmem:[%s1041_s30 + $0x10] sm:$0xff]  ;;  %v216_v27 = vld [vmem:[%s1041_s30 + $0x8] sm:$0xff] }
  0x1b   : > { %v219_v2 = vld [vmem:[%s1041_s30 + $0x20] sm:$0xff]  ;;  %v221_v3 = vld [vmem:[%s1041_s30 + $0x30] sm:$0xff]  ;;  %v248_v6 = vsel %vm247_vm0, %v215_v0, -inf  ;;  %v249_v7 = vsel %vm247_vm0, %v217_v1, -inf  ;;  %v218_v28 = vld [vmem:[%s1041_s30 + $0x18] sm:$0xff]  ;;  %v279_v34 = vsel %vm247_vm0, %v216_v27, -inf }
  0x1c   : > { %v223_v4 = vld [vmem:[%s1041_s30 + $0x40] sm:$0xff]  ;;  %v225_v5 = vld [vmem:[%s1041_s30 + $0x50] sm:$0xff]  ;;  %v250_v8 = vsel %vm247_vm0, %v219_v2, -inf  ;;  %v252_v13 = vsel %vm247_vm0, %v221_v3, -inf  ;;  %v220_v29 = vld [vmem:[%s1041_s30 + $0x28] sm:$0xff]  ;;  %v280_v35 = vsel %vm247_vm0, %v218_v28, -inf }
  0x1d   : > { %v227_v9 = vld [vmem:[%s1041_s30 + $0x60] sm:$0xff]  ;;  %v229_v10 = vld [vmem:[%s1041_s30 + $0x70] sm:$0xff]  ;;  %v1055_v12 = vmax.f32 %v248_v6, %v250_v8  ;;  %v1059_v14 = vsel %vm247_vm0, %v223_v4, -inf  ;;  %v1062_v15 = vsel %vm247_vm0, %v225_v5, -inf  ;;  %v1067_v19 = vmax.f32 %v249_v7, %v252_v13  ;;  %v222_v31 = vld [vmem:[%s1041_s30 + $0x38] sm:$0xff] }
  0x1e   : > { %v231_v11 = vld [vmem:[%s1041_s30 + $0x80] sm:$0xff]  ;;  %v233_v16 = vld [vmem:[%s1041_s30 + $0x90] sm:$0xff]  ;;  %v1070_v20 = vsel %vm247_vm0, %v227_v9, -inf  ;;  %v1073_v21 = vsel %vm247_vm0, %v229_v10, -inf  ;;  %v224_v32 = vld [vmem:[%s1041_s30 + $0x48] sm:$0xff]  ;;  %v281_v36 = vsel %vm247_vm0, %v220_v29, -inf }
  0x1f   : > { %v235_v17 = vld [vmem:[%s1041_s30 + $0xa0] sm:$0xff]  ;;  %v237_v18 = vld [vmem:[%s1041_s30 + $0xb0] sm:$0xff]  ;;  %v262_v22 = vsel %vm247_vm0, %v231_v11, -inf  ;;  %v255_v23 = vmax.f32 %v1055_v12, %v1059_v14  ;;  %v264_v24 = vsel %vm247_vm0, %v233_v16, -inf  ;;  %v257_v30 = vmax.f32 %v1067_v19, %v1062_v15  ;;  %v226_v33 = vld [vmem:[%s1041_s30 + $0x58] sm:$0xff] }
  0x20   : > { %v266_v25 = vsel %vm247_vm0, %v235_v17, -inf  ;;  %v268_v26 = vsel %vm247_vm0, %v237_v18, -inf  ;;  %v228_v38 = vld [vmem:[%s1041_s30 + $0x68] sm:$0xff]  ;;  %v230_v39 = vld [vmem:[%s1041_s30 + $0x78] sm:$0xff]  ;;  %v1096_v41 = vmax.f32 %v279_v34, %v281_v36  ;;  %v283_v42 = vsel %vm247_vm0, %v222_v31, -inf  ;;  %v239_v55 = vld [vmem:[%s1041_s30 + $0xc0] sm:$0xff] }
  0x21   : > { %v259_v37 = vmax.f32 %v255_v23, %v1070_v20  ;;  %v232_v40 = vld [vmem:[%s1041_s30 + $0x88] sm:$0xff]  ;;  %v1100_v43 = vsel %vm247_vm0, %v224_v32, -inf  ;;  %v261_v44 = vmax.f32 %v257_v30, %v1073_v21  ;;  %v234_v45 = vld [vmem:[%s1041_s30 + $0x98] sm:$0xff]  ;;  %v1106_v48 = vmax.f32 %v280_v35, %v283_v42  ;;  %v241_v60 = vld [vmem:[%s1041_s30 + $0xd0] sm:$0xff] }
  0x22   : > { %v236_v46 = vld [vmem:[%s1041_s30 + $0xa8] sm:$0xff]  ;;  %v238_v47 = vld [vmem:[%s1041_s30 + $0xb8] sm:$0xff]  ;;  %v1109_v49 = vsel %vm247_vm0, %v226_v33, -inf  ;;  %v1112_v50 = vsel %vm247_vm0, %v228_v38, -inf  ;;  %v286_v52 = vmax.f32 %v1096_v41, %v1100_v43  ;;  %v1117_v53 = vsel %vm247_vm0, %v230_v39, -inf  ;;  %v243_v61 = vld [vmem:[%s1041_s30 + $0xe0] sm:$0xff] }
  0x23   : > { %v263_v51 = vmax.f32 %v259_v37, %v262_v22  ;;  %v293_v54 = vsel %vm247_vm0, %v232_v40, -inf  ;;  %v265_v56 = vmax.f32 %v261_v44, %v264_v24  ;;  %v321_v57 = vmax.f32 %v259_v37, %v261_v44  ;;  %v245_v2 = vld [vmem:[%s1041_s30 + $0xf0] sm:$0xff]  ;;  %v240_v7 = vld [vmem:[%s1041_s30 + $0xc8] sm:$0xff]  ;;  %v242_v13 = vld [vmem:[%s1041_s30 + $0xd8] sm:$0xff] }
  0x24   : > { %v288_v58 = vmax.f32 %v1106_v48, %v1109_v49  ;;  %v295_v59 = vsel %vm247_vm0, %v234_v45, -inf  ;;  %v290_v63 = vmax.f32 %v286_v52, %v1112_v50  ;;  %v297_v0 = vsel %vm247_vm0, %v236_v46, -inf  ;;  %v244_v27 = vld [vmem:[%s1041_s30 + $0xe8] sm:$0xff]  ;;  %v246_v31 = vld [vmem:[%s1041_s30 + $0xf8] sm:$0xff]  ;;  %s816_s30 = scalar_lea.vmem %s1222_s8, 64 }
  0x25   : > { %v267_v62 = vmax.f32 %v263_v51, %v266_v25  ;;  %v299_v1 = vsel %vm247_vm0, %v238_v47, -inf  ;;  %v269_v3 = vmax.f32 %v265_v56, %v268_v26  ;;  %v323_v4 = vsel %vm247_vm0, %v321_v57, -inf  ;;  %p817_p12 = scmp.ne.s32.totalorder %s1222_s8, %s816_s30 }
  0x26   : > { %v292_v5 = vmax.f32 %v288_v58, %v1117_v53  ;;  %v1133_v6 = vsel %vm247_vm0, %v239_v55, -inf  ;;  %v324_v8 = vrot.slane %v323_v4, 4  ;;  %v294_v9 = vmax.f32 %v290_v63, %v293_v54 }
  0x27   : > { %v1137_v10 = vsel %vm247_vm0, %v241_v60, -inf  ;;  %v1140_v11 = vsel %vm247_vm0, %v243_v61, -inf  ;;  %v1144_v18 = vsel %vm247_vm0, %v245_v2, -inf  ;;  %v1146_v23 = vmax.f32 %v262_v22, %v266_v25  ;;  %p818_p13 = pnand %p817_p12, %p1019_p4 }
  0x28   : > { %v296_v16 = vmax.f32 %v292_v5, %v295_v59  ;;  %v322_v17 = vmax.f32 %v290_v63, %v292_v5  ;;  %v325_v28 = vmax.f32 %v323_v4, %v324_v8  ;;  %v298_v29 = vmax.f32 %v294_v9, %v297_v0 }
  0x29   : > { %v1149_v30 = vmax.f32 %v264_v24, %v268_v26  ;;  %v1153_v32 = vsel %vm247_vm0, %v240_v7, -inf  ;;  %v341_v35 = vmax.f32 %v1146_v23, %v1133_v6  ;;  %v1162_v22 = vsel %vm247_vm0, %v242_v13, -inf  ;;  %p819_p0 = pneg %p818_p13 }
  0x2a   : > { %v300_v33 = vmax.f32 %v296_v16, %v299_v1  ;;  %v331_v34 = vsel %vm247_vm0, %v322_v17, -inf  ;;  %v326_v24 = vrot.slane %v325_v28, 2  ;;  %v1167_v36 = vsel %vm247_vm0, %v244_v27, -inf }
  0x2b   : > { %v332_v25 = vrot.slane %v331_v34, 4  ;;  %v342_v26 = vmax.f32 %v1149_v30, %v1137_v10  ;;  %v343_v37 = vmax.f32 %v341_v35, %v1140_v11  ;;  %v1171_v38 = vsel %vm247_vm0, %v246_v31, -inf }
  0x2c   : > { %v1173_v39 = vmax.f32 %v293_v54, %v297_v0  ;;  %v1175_v40 = vmax.f32 %v295_v59, %v299_v1  ;;  %v327_v42 = vmax.f32 %v325_v28, %v326_v24  ;;  %v271_v46 = vmax.f32 %v267_v62, %v1133_v6 }
  0x2d   : > { %v333_v44 = vmax.f32 %v331_v34, %v332_v25  ;;  %v344_v45 = vmax.f32 %v342_v26, %v1144_v18  ;;  %v273_v52 = vmax.f32 %v269_v3, %v1137_v10  ;;  %v302_v54 = vmax.f32 %v298_v29, %v1153_v32 }
  0x2e   : > { %v348_v47 = vmax.f32 %v1173_v39, %v1153_v32  ;;  %v349_v51 = vmax.f32 %v1175_v40, %v1162_v22  ;;  %v328_v55 = vrot.slane %v327_v42, 1  ;;  %v275_v58 = vmax.f32 %v271_v46, %v1140_v11 }
  0x2f   : > { %v334_v56 = vrot.slane %v333_v44, 2  ;;  %v345_v57 = vmax.f32 %v343_v37, %v344_v45  ;;  %v277_v61 = vmax.f32 %v273_v52, %v1144_v18  ;;  %v304_v62 = vmax.f32 %v300_v33, %v1162_v22 }
  0x30   : > { %v350_v59 = vmax.f32 %v348_v47, %v1167_v36  ;;  %v351_v60 = vmax.f32 %v349_v51, %v1171_v38  ;;  %v329_v63 = vmax.f32 %v327_v42, %v328_v55  ;;  %v306_v2 = vmax.f32 %v302_v54, %v1167_v36 }
  0x31   : > { %v335_v0 = vmax.f32 %v333_v44, %v334_v56  ;;  %v353_v1 = vsel %vm247_vm0, %v345_v57, -inf  ;;  %v278_v5 = vmax.f32 %v275_v58, %v277_v61  ;;  %v308_v7 = vmax.f32 %v304_v62, %v1171_v38 }
  0x32   : > { %v354_v3 = vrot.slane %v353_v1, 4  ;;  %v352_v4 = vmax.f32 %v350_v59, %v351_v60  ;;  %330 = vst.msk [vmem:[%s1194_s6] sm:$0x1] %vm319_vm1, %v329_v63  ;;  %v370_v9 = vmax.f32 %v1055_v12, %v1067_v19  ;;  %v371_v13 = vmax.f32 %v1096_v41, %v1106_v48 }
  0x33   : > { %v336_v8 = vrot.slane %v335_v0, 1  ;;  %v406_v16 = vmax.f32 %v1059_v14, %v1070_v20  ;;  %v309_v28 = vmax.f32 %v306_v2, %v308_v7  ;;  %v310_v29 = vsel %vm247_vm0, %v278_v5, -inf }
  0x34   : > { %v355_v17 = vmax.f32 %v353_v1, %v354_v3  ;;  %v362_v27 = vsel %vm247_vm0, %v352_v4, -inf  ;;  %v373_v34 = vsel %vm372_vm2, %v370_v9, -inf  ;;  %v382_v35 = vsel %vm381_vm3, %v370_v9, -inf }
  0x35   : > { %v337_v31 = vmax.f32 %v335_v0, %v336_v8  ;;  %v363_v33 = vrot.slane %v362_v27, 4  ;;  %v311_v19 = vsel %vm247_vm0, %v309_v28, -inf  ;;  %v374_v41 = vrot.slane %v373_v34, 4 }
  0x36   : > { %v356_v12 = vrot.slane %v355_v17, 2  ;;  %v383_v48 = vrot.slane %v382_v35, 4  ;;  %v312_v20 = vmax.f32 %v310_v29, %v311_v19  ;;  %v390_v24 = vsel %vm372_vm2, %v371_v13, -inf }
  0x37   : > { %338 = vst.msk [vmem:[%s1194_s6 + $0x1] sm:$0x1] %vm319_vm1, %v337_v31  ;;  %v364_v14 = vmax.f32 %v362_v27, %v363_v33  ;;  %v398_v25 = vsel %vm381_vm3, %v371_v13, -inf  ;;  %v375_v37 = vmax.f32 %v373_v34, %v374_v41  ;;  %v391_v44 = vrot.slane %v390_v24, 4 }
  0x38   : > { %v357_v26 = vmax.f32 %v355_v17, %v356_v12  ;;  %v384_v42 = vmax.f32 %v382_v35, %v383_v48  ;;  %v313_v46 = vrot.slane %v312_v20, 4  ;;  %v399_v47 = vrot.slane %v398_v25, 4 }
  0x39   : > { %v365_v45 = vrot.slane %v364_v14, 2  ;;  %v407_v51 = vmax.f32 %v1062_v15, %v1073_v21  ;;  %v376_v54 = vrot.slane %v375_v37, 2  ;;  %v392_v56 = vmax.f32 %v390_v24, %v391_v44 }
  0x3a   : > { %v358_v52 = vrot.slane %v357_v26, 1  ;;  %v385_v55 = vrot.slane %v384_v42, 2  ;;  %v314_v58 = vmax.f32 %v312_v20, %v313_v46  ;;  %v400_v59 = vmax.f32 %v398_v25, %v399_v47 }
  0x3b   : > { %v366_v57 = vmax.f32 %v364_v14, %v365_v45  ;;  %v408_v60 = vmax.f32 %v406_v16, %v407_v51  ;;  %v377_v62 = vmax.f32 %v375_v37, %v376_v54  ;;  %v393_v15 = vrot.slane %v392_v56, 2 }
  0x3c   : > { %v359_v61 = vmax.f32 %v357_v26, %v358_v52  ;;  %v386_v63 = vmax.f32 %v384_v42, %v385_v55  ;;  %v315_v0 = vrot.slane %v314_v58, 2  ;;  %v401_v1 = vrot.slane %v400_v59, 2 }
  0x3d   : > { %v367_v21 = vrot.slane %v366_v57, 1  ;;  %v412_v2 = vsel %vm372_vm2, %v408_v60, -inf  ;;  %v378_v3 = vrot.slane %v377_v62, 1  ;;  %v394_v5 = vmax.f32 %v392_v56, %v393_v15 }
  0x3e   : > { %721 = vst.msk [vmem:[%s1194_s6 + $0x2] sm:$0x1] %vm319_vm1, %v359_v61  ;;  %v387_v4 = vrot.slane %v386_v63, 1  ;;  %v413_v7 = vrot.slane %v412_v2, 4  ;;  %v316_v9 = vmax.f32 %v314_v58, %v315_v0  ;;  %v402_v13 = vmax.f32 %v400_v59, %v401_v1 }
  0x3f   : > { %v368_v8 = vmax.f32 %v366_v57, %v367_v21  ;;  %v421_v16 = vsel %vm381_vm3, %v408_v60, -inf  ;;  %v379_v17 = vmax.f32 %v377_v62, %v378_v3  ;;  %v395_v28 = vrot.slane %v394_v5, 1 }
  0x40   : > { %v388_v27 = vmax.f32 %v386_v63, %v387_v4  ;;  %v414_v29 = vmax.f32 %v412_v2, %v413_v7  ;;  %v317_v31 = vrot.slane %v316_v9, 1  ;;  %v403_v33 = vrot.slane %v402_v13, 1 }
  0x41   : > { %722 = vst.msk [vmem:[%s1194_s6 + $0x3] sm:$0x1] %vm319_vm1, %v368_v8  ;;  %v422_v34 = vrot.slane %v421_v16, 4  ;;  %v409_v35 = vmax.f32 %v1100_v43, %v1112_v50  ;;  %380 = vst.msk [vmem:[%s1245_s28] sm:$0x1] %vm319_vm1, %v379_v17  ;;  %v396_v12 = vmax.f32 %v394_v5, %v395_v28  ;;  %v410_v41 = vmax.f32 %v1109_v49, %v1117_v53  ;;  %s820_s6 = sshll.u32 %s950_s5, 4  ;;  %s821_s6 = int_to_ptr.vmem [resolvable:$false] %s820_s6 }
  0x42   : > { %389 = vst.msk [vmem:[%s1245_s28 + $0x1] sm:$0x1] %vm319_vm1, %v388_v27  ;;  %v415_v19 = vrot.slane %v414_v29, 2  ;;  %v445_v48 = vmax.f32 %v1146_v23, %v1149_v30  ;;  %s822_s7 = scalar_lea.vmem %s821_s6, 128  ;;  %p823_p1 = scmp.lt.s32.totalorder %s1222_s8, %s821_s6 }
  0x43   : > { %p824_p2 = scmp.lt.s32.totalorder %s822_s7, %s816_s30 }
  0x45   : > { %p825_p3 = por %p824_p2, %p823_p1 }
  0x47   : > { %p826_p5 = pnand %p825_p3, %p819_p0 }
  0x49   : > { %829 = shalt.err (!%p826_p5)
}
  0x4a   : > { %s830_s10 = scalar_lea.hbm %s1233_s26, 64  ;;  %s834_s5 = scalar_lea.hbm %s1414_s2, 128 }
  0x4b   : > { %p831_p6 = scmp.ne.s32.totalorder %s1233_s26, %s830_s10  ;;  %p835_p10 = scmp.lt.s32.totalorder %s1233_s26, %s1414_s2 }
  0x4c   : > { %p836_p11 = scmp.lt.s32.totalorder %s834_s5, %s830_s10 }
  0x4d   : > { %p832_p7 = pnand %p831_p6, %p1019_p4 }
  0x4e   : > { %p837_p12 = por %p836_p11, %p835_p10 }
  0x4f   : > { %p833_p9 = pneg %p832_p7 }
  0x51   : > { %p838_p13 = pnand %p837_p12, %p833_p9 }
  0x53   : > { %841 = shalt.err (!%p838_p13)
}
  0x54   : > { %s951_s30 = smov 32   ;;  %s952_s6 = smov 2   ;;  %v318_v43 = vmax.f32 %v316_v9, %v317_v31  ;;  %v404_v49 = vmax.f32 %v402_v13, %v403_v33  ;;  %v423_v50 = vmax.f32 %v421_v16, %v422_v34  ;;  %v446_v53 = vmax.f32 %v1173_v39, %v1175_v40  ;;  %397 = vst.msk [vmem:[%s1245_s28 + $0x2] sm:$0x1] %vm319_vm1, %v396_v12 }
  0x55   : > { %748 = dma.vmem_to_hbm [thread:$0]  (%p1019_p4), %s1222_s8, 64, %s1233_s26, %s524_s29, %s951_s30, %s951_s30, %s952_s6   ;;  %v416_v23 = vmax.f32 %v414_v29, %v415_v19  ;;  %v411_v30 = vmax.f32 %v409_v35, %v410_v41  ;;  %v447_v14 = vsel %vm372_vm2, %v445_v48, -inf  ;;  %v456_v20 = vsel %vm381_vm3, %v445_v48, -inf }
  0x56   : > { %s1285_s7 = scalar_lea.hbm %s1413_s1, %s737_s27  ;;  %s1420_s8 = scalar_lea.vmem [#allocation2], %s1156_s4  ;;  %405 = vst.msk [vmem:[%s1245_s28 + $0x3] sm:$0x1] %vm319_vm1, %v404_v49  ;;  %v424_v39 = vrot.slane %v423_v50, 2  ;;  %v448_v40 = vrot.slane %v447_v14, 4  ;;  %v457_v24 = vrot.slane %v456_v20, 4 }
  0x57   : > { %320 = vst.msk [vmem:[%s1420_s8] sm:$0x1] %vm319_vm1, %v318_v43  ;;  %v464_v25 = vsel %vm372_vm2, %v446_v53, -inf  ;;  %v417_v26 = vrot.slane %v416_v23, 1  ;;  %v429_v37 = vsel %vm372_vm2, %v411_v30, -inf  ;;  %v437_v42 = vsel %vm381_vm3, %v411_v30, -inf }
  0x58   : > { %v465_v44 = vrot.slane %v464_v25, 4  ;;  %s520_s26 = scalar_lea.sflag [#allocation3], %s1156_s4  ;;  %s842_s27 = scalar_lea.vmem %s1239_s21, 16 }
  0x59   : > { %p843_p0 = scmp.ne.s32.totalorder %s1239_s21, %s842_s27  ;;  %s953_s10 = smov [#allocation2]  }
  0x5a   : > { %s846_s18 = sshll.u32 %s953_s10, 4  ;;  %s847_s18 = int_to_ptr.vmem [resolvable:$false] %s846_s18 }
  0x5b   : > { %p844_p1 = pnand %p843_p0, %p1019_p4  ;;  %s848_s23 = scalar_lea.vmem %s847_s18, 32 }
  0x5c   : > { %p849_p3 = scmp.lt.s32.totalorder %s1239_s21, %s847_s18  ;;  %p850_p5 = scmp.lt.s32.totalorder %s848_s23, %s842_s27 }
  0x5d   : > { %p845_p2 = pneg %p844_p1 }
  0x5e   : > { %p851_p6 = por %p850_p5, %p849_p3 }
  0x60   : > { %p852_p7 = pnand %p851_p6, %p845_p2 }
  0x62   : > { %855 = shalt.err (!%p852_p7)
}
  0x63   : > { %s856_s5 = scalar_lea.hbm %s1285_s7, 16  ;;  %s860_s6 = scalar_lea.hbm %s1413_s1, 32 }
  0x64   : > { %p857_p9 = scmp.ne.s32.totalorder %s1285_s7, %s856_s5  ;;  %p861_p12 = scmp.lt.s32.totalorder %s1285_s7, %s1413_s1 }
  0x65   : > { %p862_p13 = scmp.lt.s32.totalorder %s860_s6, %s856_s5 }
  0x66   : > { %p858_p10 = pnand %p857_p9, %p1019_p4 }
  0x67   : > { %p863_p0 = por %p862_p13, %p861_p12 }
  0x68   : > { %p859_p11 = pneg %p858_p10 }
  0x6a   : > { %p864_p1 = pnand %p863_p0, %p859_p11 }
  0x6c   : > { %867 = shalt.err (!%p864_p1)
}
  0x6d   : > { %747 = dma.vmem_to_hbm [thread:$0]  (%p1019_p4), %s1239_s21, 16, %s1285_s7, %s520_s26   ;;  %v425_v45 = vmax.f32 %v423_v50, %v424_v39  ;;  %v430_v46 = vrot.slane %v429_v37, 4  ;;  %v438_v47 = vrot.slane %v437_v42, 4  ;;  %v449_v51 = vmax.f32 %v447_v14, %v448_v40 }
  0x6e   : > { %v418_v52 = vmax.f32 %v416_v23, %v417_v26  ;;  %v458_v54 = vmax.f32 %v456_v20, %v457_v24  ;;  %v466_v55 = vmax.f32 %v464_v25, %v465_v44  ;;  %v472_v56 = vsel %vm381_vm3, %v446_v53, -inf  ;;  %s574_s21 = sshll.u32 %s1245_s28, 4  ;;  %s746_s7 = sshll.u32 %s940_s15, 8  ;;  %s1353_s21 = int_to_ptr.vmem [resolvable:$true] %s574_s21 }
  0x6f   : > { %v426_v57 = vrot.slane %v425_v45, 1  ;;  %v431_v58 = vmax.f32 %v429_v37, %v430_v46  ;;  %v439_v59 = vmax.f32 %v437_v42, %v438_v47  ;;  %v450_v60 = vrot.slane %v449_v51, 2  ;;  %s1360_s27 = scalar_lea.hbm %s1415_s3, %s746_s7  ;;  %s868_s15 = scalar_lea.vmem %s1353_s21, 256 }
  0x70   : > { %723 = vst.msk [vmem:[%s1245_s28 + $0x4] sm:$0x1] %vm319_vm1, %v418_v52  ;;  %v459_v61 = vrot.slane %v458_v54, 2  ;;  %v467_v62 = vrot.slane %v466_v55, 2  ;;  %v473_v63 = vrot.slane %v472_v56, 4  ;;  %v480_v15 = vmax.f32 %v1133_v6, %v1140_v11  ;;  %p869_p2 = scmp.ne.s32.totalorder %s1353_s21, %s868_s15  ;;  %s954_s10 = smov [#allocation6]  }
  0x71   : > { %v427_v21 = vmax.f32 %v425_v45, %v426_v57  ;;  %v432_v0 = vrot.slane %v431_v58, 2  ;;  %v440_v1 = vrot.slane %v439_v59, 2  ;;  %v451_v2 = vmax.f32 %v449_v51, %v450_v60  ;;  %s872_s18 = sshll.u32 %s954_s10, 4  ;;  %s873_s18 = int_to_ptr.vmem [resolvable:$false] %s872_s18 }
  0x72   : > { %v460_v3 = vmax.f32 %v458_v54, %v459_v61  ;;  %v468_v4 = vmax.f32 %v466_v55, %v467_v62  ;;  %v474_v5 = vmax.f32 %v472_v56, %v473_v63  ;;  %v481_v7 = vmax.f32 %v1137_v10, %v1144_v18  ;;  %p870_p3 = pnand %p869_p2, %p1019_p4  ;;  %s874_s23 = scalar_lea.vmem %s873_s18, 512 }
  0x73   : > { %724 = vst.msk [vmem:[%s1245_s28 + $0x5] sm:$0x1] %vm319_vm1, %v427_v21  ;;  %v433_v8 = vmax.f32 %v431_v58, %v432_v0  ;;  %v441_v9 = vmax.f32 %v439_v59, %v440_v1  ;;  %v452_v13 = vrot.slane %v451_v2, 1  ;;  %v483_v16 = vmax.f32 %v1153_v32, %v1167_v36  ;;  %p875_p6 = scmp.lt.s32.totalorder %s1353_s21, %s873_s18  ;;  %p876_p7 = scmp.lt.s32.totalorder %s874_s23, %s868_s15 }
  0x74   : > { %v461_v6 = vrot.slane %v460_v3, 1  ;;  %v469_v11 = vrot.slane %v468_v4, 1  ;;  %v475_v17 = vrot.slane %v474_v5, 2  ;;  %v482_v27 = vmax.f32 %v480_v15, %v481_v7  ;;  %p871_p5 = pneg %p870_p3 }
  0x75   : > { %v434_v28 = vrot.slane %v433_v8, 1  ;;  %v442_v29 = vrot.slane %v441_v9, 1  ;;  %v453_v31 = vmax.f32 %v451_v2, %v452_v13  ;;  %v484_v10 = vmax.f32 %v1162_v22, %v1171_v38  ;;  %p877_p9 = por %p876_p7, %p875_p6 }
  0x76   : > { %v462_v18 = vmax.f32 %v460_v3, %v461_v6  ;;  %v470_v33 = vmax.f32 %v468_v4, %v469_v11  ;;  %v476_v34 = vmax.f32 %v474_v5, %v475_v17  ;;  %v486_v35 = vsel %vm372_vm2, %v482_v27, -inf }
  0x77   : > { %v435_v32 = vmax.f32 %v433_v8, %v434_v28  ;;  %v443_v36 = vmax.f32 %v441_v9, %v442_v29  ;;  %727 = vst.msk [vmem:[%s1245_s28 + $0x8] sm:$0x1] %vm319_vm1, %v453_v31  ;;  %v487_v12 = vrot.slane %v486_v35, 4  ;;  %v495_v19 = vsel %vm381_vm3, %v482_v27, -inf  ;;  %p878_p10 = pnand %p877_p9, %p871_p5 }
  0x78   : > { %728 = vst.msk [vmem:[%s1245_s28 + $0x9] sm:$0x1] %vm319_vm1, %v462_v18  ;;  %729 = vst.msk [vmem:[%s1245_s28 + $0xa] sm:$0x1] %vm319_vm1, %v470_v33  ;;  %v477_v41 = vrot.slane %v476_v34, 1  ;;  %v496_v22 = vrot.slane %v495_v19, 4  ;;  %v485_v38 = vmax.f32 %v483_v16, %v484_v10 }
  0x79   : > { %725 = vst.msk [vmem:[%s1245_s28 + $0x6] sm:$0x1] %vm319_vm1, %v435_v32  ;;  %726 = vst.msk [vmem:[%s1245_s28 + $0x7] sm:$0x1] %vm319_vm1, %v443_v36  ;;  %v488_v48 = vmax.f32 %v486_v35, %v487_v12 }
  0x7a   : > { %v478_v43 = vmax.f32 %v476_v34, %v477_v41  ;;  %v497_v49 = vmax.f32 %v495_v19, %v496_v22  ;;  %v503_v50 = vsel %vm372_vm2, %v485_v38, -inf  ;;  %v511_v53 = vsel %vm381_vm3, %v485_v38, -inf }
  0x7b   : > { %v489_v23 = vrot.slane %v488_v48, 2  ;;  %v504_v30 = vrot.slane %v503_v50, 4  ;;  %v512_v14 = vrot.slane %v511_v53, 4 }
  0x7c   : > { %730 = vst.msk [vmem:[%s1245_s28 + $0xb] sm:$0x1] %vm319_vm1, %v478_v43  ;;  %v498_v20 = vrot.slane %v497_v49, 2 }
  0x7d   : > { %v490_v39 = vmax.f32 %v488_v48, %v489_v23  ;;  %v505_v40 = vmax.f32 %v503_v50, %v504_v30  ;;  %v513_v24 = vmax.f32 %v511_v53, %v512_v14 }
  0x7e   : > { %v499_v25 = vmax.f32 %v497_v49, %v498_v20 }
  0x7f   : > { %v491_v26 = vrot.slane %v490_v39, 1  ;;  %v506_v37 = vrot.slane %v505_v40, 2  ;;  %v514_v42 = vrot.slane %v513_v24, 2 }
  0x80   : > { %v500_v44 = vrot.slane %v499_v25, 1 }
  0x81   : > { %v492_v45 = vmax.f32 %v490_v39, %v491_v26  ;;  %v507_v46 = vmax.f32 %v505_v40, %v506_v37  ;;  %v515_v47 = vmax.f32 %v513_v24, %v514_v42 }
  0x82   : > { %v501_v51 = vmax.f32 %v499_v25, %v500_v44 }
  0x83   : > { %731 = vst.msk [vmem:[%s1245_s28 + $0xc] sm:$0x1] %vm319_vm1, %v492_v45  ;;  %v508_v52 = vrot.slane %v507_v46, 1  ;;  %v516_v54 = vrot.slane %v515_v47, 1 }
  0x84   : > { %732 = vst.msk [vmem:[%s1245_s28 + $0xd] sm:$0x1] %vm319_vm1, %v501_v51 }
  0x85   : > { %v509_v55 = vmax.f32 %v507_v46, %v508_v52  ;;  %v517_v56 = vmax.f32 %v515_v47, %v516_v54 }
  0x87   : > { %733 = vst.msk [vmem:[%s1245_s28 + $0xe] sm:$0x1] %vm319_vm1, %v509_v55  ;;  %734 = vst.msk [vmem:[%s1245_s28 + $0xf] sm:$0x1] %vm319_vm1, %v517_v56 }
  0x88   : > { %881 = shalt.err (!%p878_p10)
}
  0x89   : > { %s882_s5 = scalar_lea.hbm %s1360_s27, 256  ;;  %s886_s30 = scalar_lea.hbm %s1415_s3, 512 }
  0x8a   : > { %p883_p11 = scmp.ne.s32.totalorder %s1360_s27, %s882_s5  ;;  %p887_p0 = scmp.lt.s32.totalorder %s1360_s27, %s1415_s3 }
  0x8b   : > { %p888_p1 = scmp.lt.s32.totalorder %s886_s30, %s882_s5 }
  0x8c   : > { %p884_p12 = pnand %p883_p11, %p1019_p4 }
  0x8d   : > { %p889_p2 = por %p888_p1, %p887_p0 }
  0x8e   : > { %p885_p13 = pneg %p884_p12 }
  0x90   : > { %p890_p3 = pnand %p889_p2, %p885_p13 }
  0x92   : > { %893 = shalt.err (!%p890_p3)
}
  0x93   : > { %s955_s11 = smov 64   ;;  %s956_s7 = smov 4  }
  0x94   : > { %749 = dma.vmem_to_hbm [thread:$0]  (%p1019_p4), %s1353_s21, 256, %s1360_s27, %s524_s29, %s955_s11, %s955_s11, %s956_s7  }
  0x95 PF: > { %p763_p5 = scmp.ge.s32.totalorder %s948_s17, 2  ;;  %s589_s8 = sand.u32 1, %s928_s12  }
  0x96   : > { %s590_s26 = scalar_lea.sflag [#allocation3], %s589_s8 }
  0x97   : > { %p754_p6 = pnand %p763_p5, %p1028_p8 }
  0x99   : > { %p755_p7 = pneg %p754_p6 }
  0x9b   : > { %919 = dma.done.wait (%p755_p7), %s590_s26, 16  }
  0x9c   : > { %921 = vsyncadd (%p755_p7), %s590_s26, 4294967280  ;;  %s1421_s15 = sadd.s32 4294967294, %s948_s17  }
  0x9d   : > { %s597_s10 = sand.u32 1, %s1421_s15  }
  0x9e   : > { %s598_s18 = scalar_lea.sflag [#allocation5], %s597_s10 }
  0x9f   : > { %923 = dma.done.wait (%p755_p7), %s598_s18, 320  }
  0xa0   : > { %925 = vsyncadd (%p755_p7), %s598_s18, 4294966976  ;;  %s20_s17 = sadd.s32 1, %s948_s17   ;;  %s1422_s12 = smov %s932_s13 }
  0xa1   : > { %p17_p4 = scmp.ge.s32.totalorder %s20_s17, 4   ;;  %s1423_s13 = smov %s936_s14 }
  0xa2   : > { %s1424_s14 = smov %s1034_s25  ;;  %s1425_s15 = smov %s944_s16 }
  0xa3   : > { %s1426_s16 = smov %s1428_s20  ;;  %19 = sbr.rel (!%p17_p4) target bundleno = 6 (0x6), region = 95 }
  0xa8   :  { %612 = vsyncpa [#allocation3], 1 }
  0xa9   :  { %614 = vsyncpa [#allocation3 + $0x1], 1 }
  0xaa   :  { %615 = vsyncpa [#allocation5], 1 }
  0xab   :  { %617 = vsyncpa [#allocation5 + $0x1], 1 }

</bundles_post_ra>
